<compile_context>
chip_gen: v6e
topology: v6e:2x2x1
jax: 0.10.0
libtpu: 0.0.40
codegen_flags: <defaults>
</compile_context>

<pallas_src>
import functools
import math

import jax
import jax.numpy as jnp
from jax.experimental import pallas as pl
from jax.experimental.pallas import tpu as pltpu

LANE = 128


def _round_up(n, m):
    return ((n + m - 1) // m) * m


def _fused_mlp_kernel(x_ref, w_ref, b_ref, o_ref, *, n_hidden, in_pad, h_pad):
    """Fused whole-MLP forward (eval mode), everything in VMEM.

    x_ref : (B, in_pad)                       f32  input activations
    w_ref : (in_pad + n_hidden*h_pad, h_pad)  bf16 packed weights [W0; W1'; ...; W_last']
            (eval-mode BatchNorm affine already folded into W1'..W_last' / b1'..b_last')
    b_ref : (n_hidden + 1, h_pad)             f32  packed biases   [b0; b1'; ...; b_last']
    o_ref : (B, h_pad)                        f32  lane-dense (padded) output
    """
    h = x_ref[...]
    row = 0
    for li in range(n_hidden + 1):
        k = in_pad if li == 0 else h_pad
        w = w_ref[row:row + k, :]                      # static, tile-aligned slice (bf16)
        row += k
        # bf16 x bf16 matmul on the MXU, f32 accumulation.
        h = jnp.dot(h.astype(jnp.bfloat16), w,
                    preferred_element_type=jnp.float32)
        h = h + b_ref[li:li + 1, :]                    # f32 bias (broadcast over rows)
        if li < n_hidden:
            h = jnp.maximum(h, 0.0)                    # ReLU
            # dropout: identity in eval mode
            # BatchNorm1d (eval): folded into the next layer's weight/bias at init.
    o_ref[...] = h


def make_mlp_forward(input_size, in_pad, h_pad, n_hidden, output_size):
    """Returns a jitted forward: (w_slab, b_slab, x) -> (B, output_size)."""
    kernel = functools.partial(_fused_mlp_kernel,
                               n_hidden=n_hidden, in_pad=in_pad, h_pad=h_pad)
    vmem_spec = pl.BlockSpec(memory_space=pltpu.MemorySpace.VMEM)

    @jax.jit
    def forward(w_slab, b_slab, x):
        x2d = x.reshape(-1, input_size).astype(jnp.float32)   # x.view(-1, input_size)
        if in_pad != input_size:                               # no-op for input_size=256
            x2d = jnp.pad(x2d, ((0, 0), (0, in_pad - input_size)))
        B = x2d.shape[0]

        flops = 2 * B * (in_pad * h_pad + n_hidden * h_pad * h_pad)
        bytes_accessed = (x2d.size * 4 + w_slab.size * 2 +
                          b_slab.size * 4 + B * h_pad * 4)

        out_pad = pl.pallas_call(
            kernel,
            out_shape=jax.ShapeDtypeStruct((B, h_pad), jnp.float32),
            in_specs=[vmem_spec, vmem_spec, vmem_spec],
            out_specs=vmem_spec,
            cost_estimate=pl.CostEstimate(flops=flops, transcendentals=0,
                                          bytes_accessed=bytes_accessed),
        )(x2d, w_slab, b_slab)
        return out_pad[:, :output_size]

    return forward


def _xavier_uniform_t(key, fan_in, fan_out):
    # PyTorch xavier_uniform_ on a (out, in) weight; stored pre-transposed as (in, out).
    bound = math.sqrt(6.0 / (fan_in + fan_out))
    return jax.random.uniform(key, (fan_in, fan_out), jnp.float32,
                              minval=-bound, maxval=bound)


def init_mlp_params(key, input_size, hidden_sizes, output_size, n_layers):
    sizes = [input_size, hidden_sizes[0]]
    sizes += [hidden_sizes[i + 1] for i in range(n_layers - 2)]
    sizes += [output_size]
    n_linear = len(sizes) - 1
    n_hidden = n_linear - 1
    H = hidden_sizes[0]
    # The module applies the single BatchNorm1d(hidden_sizes[0]) after every hidden layer.
    assert all(s == H for s in sizes[1:-1]), "all hidden sizes must equal hidden_sizes[0]"

    keys = jax.random.split(key, 2 * n_linear)
    weights_t, biases = [], []
    for li in range(n_linear):
        fan_in, fan_out = sizes[li], sizes[li + 1]
        weights_t.append(_xavier_uniform_t(keys[2 * li], fan_in, fan_out))
        bb = 1.0 / math.sqrt(fan_in)   # nn.Linear default bias init
        biases.append(jax.random.uniform(keys[2 * li + 1], (fan_out,), jnp.float32,
                                         minval=-bb, maxval=bb))

    # BatchNorm1d(H) eval-mode defaults -> scale/shift.
    eps = 1e-5
    gamma, beta = jnp.ones((H,), jnp.float32), jnp.zeros((H,), jnp.float32)
    run_mean, run_var = jnp.zeros((H,), jnp.float32), jnp.ones((H,), jnp.float32)
    bn_scale = gamma / jnp.sqrt(run_var + eps)
    bn_shift = beta - run_mean * bn_scale

    # Fold BN (applied after every hidden layer's ReLU) into the *next* linear — exact.
    folded_w, folded_b = [weights_t[0]], [biases[0]]
    for li in range(1, n_linear):
        w, b = weights_t[li], biases[li]
        folded_w.append(bn_scale[:, None] * w)          # W' = diag(scale) @ W  (W is (in,out))
        folded_b.append(b + bn_shift @ w)               # b' = b + shift @ W

    # Lane-dense padding + packing: one bf16 weight slab, one f32 bias slab.
    in_pad = _round_up(input_size, LANE)
    h_pad = _round_up(max(H, output_size), LANE)

    w_blocks, b_rows = [], []
    for li in range(n_linear):
        k = in_pad if li == 0 else h_pad
        blk = jnp.zeros((k, h_pad), jnp.float32)
        blk = blk.at[:folded_w[li].shape[0], :folded_w[li].shape[1]].set(folded_w[li])
        w_blocks.append(blk)
        b_rows.append(jnp.zeros((h_pad,), jnp.float32).at[:folded_b[li].shape[0]]
                      .set(folded_b[li]))
    w_slab = jnp.concatenate(w_blocks, axis=0).astype(jnp.bfloat16)   # (in_pad+nh*h_pad, h_pad)
    b_slab = jnp.stack(b_rows, axis=0)                                # (n_linear, h_pad) f32

    return {
        "w_slab": w_slab, "b_slab": b_slab,
        # kept (f32, unfolded) for the pure-JAX reference check:
        "weights_t": weights_t, "biases": biases,
        "bn_scale": bn_scale, "bn_shift": bn_shift,
    }, dict(input_size=input_size, in_pad=in_pad, h_pad=h_pad,
            n_hidden=n_hidden, output_size=output_size)


if __name__ == "__main__":
    # Module hyper-params (small, consistent with the forward pass)
    input_size = 256
    hidden_sizes = [64, 64]
    output_size = 10
    n_layers = 3           # linears: 256->64, 64->64, 64->10
    dropout_p = 0.1        # identity in eval mode
    dataset_name = "synthetic"

    key = jax.random.PRNGKey(0)
    pkey, xkey = jax.random.split(key)
    params, cfg = init_mlp_params(pkey, input_size, hidden_sizes, output_size, n_layers)
    mlp_forward = make_mlp_forward(**cfg)

    # Example input: NCHW-ish tensor; forward flattens via view(-1, input_size)
    # (2*4*16*16 = 2048 elements -> 8 rows of 256 features)
    x = jax.random.normal(xkey, (2, 4, 16, 16), jnp.float32)

    out = mlp_forward(params["w_slab"], params["b_slab"], x)
    out = jax.block_until_ready(out)

    # Pure-JAX f32 reference with the original (unfolded, unpadded) eval-mode semantics.
    def ref_forward(p, x):
        h = x.reshape(-1, input_size)
        for li in range(len(p["weights_t"]) - 1):
            h = jnp.maximum(h @ p["weights_t"][li] + p["biases"][li], 0.0)   # Linear + ReLU
            h = h * p["bn_scale"] + p["bn_shift"]                            # eval BatchNorm1d
        return h @ p["weights_t"][-1] + p["biases"][-1]

    ref = ref_forward(params, x)
    assert out.shape == (8, output_size), out.shape
    # Tolerance accounts for bf16 matmul inputs in the kernel vs the f32 reference.
    assert jnp.allclose(out, ref, atol=5e-2, rtol=5e-2), "mismatch vs reference"

    print("KERNEL_OK")
</pallas_src>

<mosaic_0001>
module attributes {stable_mosaic.version = 11 : i64} {
  func.func @_fused_mlp_kernel(%arg0: memref<8x256xf32, #tpu.memory_space<vmem>>, %arg1: memref<512x128xbf16, #tpu.memory_space<vmem>>, %arg2: memref<3x128xf32, #tpu.memory_space<vmem>>, %arg3: memref<8x128xf32, #tpu.memory_space<vmem>>) attributes {dimension_semantics = [], scalar_prefetch = 0 : i64, scratch_operands = 0 : i64, tpu.core_type = #tpu.core_type<tc>} {
    %c0 = arith.constant 0 : index
    %c0_0 = arith.constant 0 : index
    %0 = vector.load %arg0[%c0, %c0_0] : memref<8x256xf32, #tpu.memory_space<vmem>>, vector<8x256xf32>
    %c0_1 = arith.constant 0 : index
    %c0_2 = arith.constant 0 : index
    %1 = vector.load %arg1[%c0_1, %c0_2] : memref<512x128xbf16, #tpu.memory_space<vmem>>, vector<256x128xbf16>
    %2 = arith.truncf %0 : vector<8x256xf32> to vector<8x256xbf16>
    %cst = arith.constant dense<0.000000e+00> : vector<8x128xf32>
    %3 = tpu.matmul %2, %1, %cst {dimension_numbers = #tpu.dot_dimension_numbers<[1], [0], [0], [1], [0, 0, 1, 1], [], []>} : vector<8x256xbf16>, vector<256x128xbf16>, vector<8x128xf32> -> vector<8x128xf32>
    %c0_3 = arith.constant 0 : index
    %c0_4 = arith.constant 0 : index
    %4 = vector.load %arg2[%c0_3, %c0_4] : memref<3x128xf32, #tpu.memory_space<vmem>>, vector<1x128xf32>
    %5 = vector.broadcast %4 : vector<1x128xf32> to vector<8x128xf32>
    %6 = arith.addf %3, %5 : vector<8x128xf32>
    %cst_5 = arith.constant 0.000000e+00 : f32
    %7 = vector.broadcast %cst_5 : f32 to vector<8x128xf32>
    %8 = arith.maximumf %6, %7 : vector<8x128xf32>
    %c256 = arith.constant 256 : index
    %c0_6 = arith.constant 0 : index
    %9 = vector.load %arg1[%c256, %c0_6] : memref<512x128xbf16, #tpu.memory_space<vmem>>, vector<128x128xbf16>
    %10 = arith.truncf %8 : vector<8x128xf32> to vector<8x128xbf16>
    %cst_7 = arith.constant dense<0.000000e+00> : vector<8x128xf32>
    %11 = tpu.matmul %10, %9, %cst_7 {dimension_numbers = #tpu.dot_dimension_numbers<[1], [0], [0], [1], [0, 0, 1, 1], [], []>} : vector<8x128xbf16>, vector<128x128xbf16>, vector<8x128xf32> -> vector<8x128xf32>
    %c1 = arith.constant 1 : index
    %c0_8 = arith.constant 0 : index
    %12 = vector.load %arg2[%c1, %c0_8] : memref<3x128xf32, #tpu.memory_space<vmem>>, vector<1x128xf32>
    %13 = vector.broadcast %12 : vector<1x128xf32> to vector<8x128xf32>
    %14 = arith.addf %11, %13 : vector<8x128xf32>
    %cst_9 = arith.constant 0.000000e+00 : f32
    %15 = vector.broadcast %cst_9 : f32 to vector<8x128xf32>
    %16 = arith.maximumf %14, %15 : vector<8x128xf32>
    %c384 = arith.constant 384 : index
    %c0_10 = arith.constant 0 : index
    %17 = vector.load %arg1[%c384, %c0_10] : memref<512x128xbf16, #tpu.memory_space<vmem>>, vector<128x128xbf16>
    %18 = arith.truncf %16 : vector<8x128xf32> to vector<8x128xbf16>
    %cst_11 = arith.constant dense<0.000000e+00> : vector<8x128xf32>
    %19 = tpu.matmul %18, %17, %cst_11 {dimension_numbers = #tpu.dot_dimension_numbers<[1], [0], [0], [1], [0, 0, 1, 1], [], []>} : vector<8x128xbf16>, vector<128x128xbf16>, vector<8x128xf32> -> vector<8x128xf32>
    %c2 = arith.constant 2 : index
    %c0_12 = arith.constant 0 : index
    %20 = vector.load %arg2[%c2, %c0_12] : memref<3x128xf32, #tpu.memory_space<vmem>>, vector<1x128xf32>
    %21 = vector.broadcast %20 : vector<1x128xf32> to vector<8x128xf32>
    %22 = arith.addf %19, %21 : vector<8x128xf32>
    %c0_13 = arith.constant 0 : index
    %c0_14 = arith.constant 0 : index
    %23 = vector.load %arg3[%c0_13, %c0_14] : memref<8x128xf32, #tpu.memory_space<vmem>>, vector<8x128xf32>
    tpu.vector_store %arg3[%c0_13, %c0_14], %22 {strides = array<i32>} : memref<8x128xf32, #tpu.memory_space<vmem>>, vector<8x128xf32>,
    return
  }
}

</mosaic_0001>

<bundles_post_ra>
// kernel: forward.1
= control target key start
LH: loop header
LB: loop body
LE: loop exit
PB: predicated region body
PF: predicated region fallthrough
CT: control target
= control target key end

     0   :  { %8 = vsyncpa [#allocation3], 0  ;;  %s707_s0 = inlined_call_operand.vmem [shape: f32[8,256], index: 0, kind: input, shape index: {}]   ;;  %s708_s1 = inlined_call_operand.hbm [shape: bf16[512,128], index: 1, kind: input, shape index: {}]   ;;  %s709_s2 = inlined_call_operand.vmem [shape: f32[3,128], index: 2, kind: input, shape index: {}]   ;;  %s710_s3 = inlined_call_operand.hbm [shape: f32[8,128], index: 3, kind: output, shape index: {}]  }
   0x1   :  { %9 = vsyncpa [#allocation4], 0  ;;  %s642_s12 = smov [#allocation2]  }
   0x2   :  { %s17_s13 = sshll.u32 %s642_s12, 4  ;;  %s18_s13 = int_to_ptr.vmem [resolvable:$true] %s17_s13 }
   0x3   :  { %s606_s14 = scalar_lea.vmem %s18_s13, 4096  ;;  %p611_p1 = scmp.lt.s32.totalorder %s18_s13, %s18_s13 }
   0x4   :  { %p607_p0 = scmp.ne.s32.totalorder %s18_s13, %s606_s14  ;;  %p612_p2 = scmp.lt.s32.totalorder %s606_s14, %s606_s14 }
   0x6   :  { %p613_p3 = por %p612_p2, %p611_p1 }
   0x8   :  { %p614_p4 = pnand %p613_p3, %p607_p0 }
   0xa   :  { %617 = shalt.err (!%p614_p4)
}
   0xb   :  { %s643_s15 = smov 64   ;;  %s644_s16 = smov 4  }
   0xc   :  { %23 = dma.hbm_to_vmem [thread:$0]  %s708_s1, 4096, %s18_s13, [#allocation3], %s643_s15, %s643_s15, %s644_s16  }
   0xd   :  { %638 = dma.done.wait [#allocation3], 4096  }
   0xe   :  { %639 = vsyncadd [#allocation3], 4294963200  ;;  %v645_v0 = vmov 0.0   ;;  %v566_v1 = vld [vmem:[#allocation2 + $0x78] sm:$0xff]   ;;  %v568_v3 = vld [vmem:[#allocation2 + $0x70] sm:$0xff]   ;;  %vm646_vm0 = vmmov 0  }
   0xf   :  { %520 = vmatprep.subr.bf16.mxu1 %v645_v0  ;;  %v567_v2 = vld [vmem:[#allocation2 + $0x38] sm:$0xff]   ;;  %480 = vmatprep.subr.bf16.mxu0 %v566_v1  ;;  %v569_v4 = vld [vmem:[#allocation2 + $0x30] sm:$0xff]   ;;  %v570_v5 = vld [vmem:[#allocation2 + $0x68] sm:$0xff]   ;;  %s647_s27 = smov [#allocation5]  }
  0x10   :  { %481 = vmatpush3.bf16.msra.mxu0 %v567_v2  ;;  %v571_v6 = vld [vmem:[#allocation2 + $0x28] sm:$0xff]   ;;  %v572_v7 = vld [vmem:[#allocation2 + $0x60] sm:$0xff]   ;;  %v574_v9 = vld [vmem:[#allocation2 + $0x58] sm:$0xff]   ;;  %536 = vmatprep.mubr.msk.bf16.mxu1 %vm646_vm0, %v645_v0  ;;  %s436_s28 = sshll.u32 %s647_s27, 4  ;;  %s437_s28 = int_to_ptr.vmem [resolvable:$true] %s436_s28 }
  0x11   :  { %482 = vmatprep.subr.bf16.mxu0 %v568_v3  ;;  %v573_v8 = vld [vmem:[#allocation2 + $0x20] sm:$0xff]   ;;  %v575_v10 = vld [vmem:[#allocation2 + $0x18] sm:$0xff]   ;;  %v576_v11 = vld [vmem:[#allocation2 + $0x50] sm:$0xff]   ;;  %s618_s29 = scalar_lea.vmem %s437_s28, 128  ;;  %p623_p6 = scmp.lt.s32.totalorder %s437_s28, %s437_s28 }
  0x12   :  { %v31_v12 = vld [vmem:[%s707_s0 + $0x8] sm:$0xff]  ;;  %v582_v14 = vld [vmem:[#allocation2 + $0xb8] sm:$0xff]   ;;  %v577_v15 = vld [vmem:[#allocation2 + $0x10] sm:$0xff]   ;;  %p619_p5 = scmp.ne.s32.totalorder %s437_s28, %s618_s29  ;;  %p624_p7 = scmp.lt.s32.totalorder %s618_s29, %s618_s29 }
  0x13   :  { %v65_v13 = vpack.c.bf16 %v31_v12, %v31_v12  ;;  %v578_v16 = vld [vmem:[#allocation2 + $0x48] sm:$0xff]   ;;  %521 = vmatpush3.bf16.msra.mxu1 %v582_v14  ;;  %v583_v17 = vld [vmem:[#allocation2 + $0xb0] sm:$0xff]   ;;  %v580_v19 = vld [vmem:[#allocation2 + $0x40] sm:$0xff]  }
  0x14   :  { %483 = vmatpush3.bf16.msra.mxu0 %v569_v4  ;;  %v579_v18 = vld [vmem:[#allocation2 + $0x8] sm:$0xff]   ;;  %522 = vmatprep.subr.bf16.mxu1 %v645_v0  ;;  %v581_v21 = vld [vmem:[#allocation2] sm:$0xff]   ;;  %v586_v25 = vld [vmem:[#allocation2 + $0x98] sm:$0xff]   ;;  %p625_p8 = por %p624_p7, %p623_p6 }
  0x15   :  { %484 = vmatprep.subr.bf16.mxu0 %v570_v5  ;;  %199 = vmatprep.mubr.bf16.mxu0 %v65_v13  ;;  %v584_v20 = vld [vmem:[#allocation2 + $0xa8] sm:$0xff]   ;;  %v30_v22 = vld [vmem:[%s707_s0] sm:$0xff]  ;;  %v587_v26 = vld [vmem:[#allocation2 + $0x90] sm:$0xff]  }
  0x16   :  { %v585_v23 = vld [vmem:[#allocation2 + $0xa0] sm:$0xff]   ;;  %v64_v24 = vpack.c.bf16 %v30_v22, %v30_v22  ;;  %v588_v27 = vld [vmem:[#allocation2 + $0x88] sm:$0xff]   ;;  %v590_v29 = vld [vmem:[#allocation2 + $0xf8] sm:$0xff]   ;;  %p626_p9 = pnand %p625_p8, %p619_p5 }
  0x17   :  { %523 = vmatpush3.bf16.msra.mxu1 %v583_v17  ;;  %v589_v28 = vld [vmem:[#allocation2 + $0x80] sm:$0xff]   ;;  %v591_v30 = vld [vmem:[#allocation2 + $0xf0] sm:$0xff]   ;;  %v592_v31 = vld [vmem:[#allocation2 + $0xe8] sm:$0xff]  }
  0x18   :  { %485 = vmatpush3.bf16.msra.mxu0 %v571_v6  ;;  %524 = vmatprep.subr.bf16.mxu1 %v645_v0  ;;  %v593_v32 = vld [vmem:[#allocation2 + $0xe0] sm:$0xff]   ;;  %v594_v33 = vld [vmem:[#allocation2 + $0xd8] sm:$0xff]   ;;  %v595_v34 = vld [vmem:[#allocation2 + $0xd0] sm:$0xff]  }
  0x19   :  { %486 = vmatprep.subr.bf16.mxu0 %v572_v7  ;;  %v445_v36 = vld [vmem:[%s709_s2] ss:$0 sm:$0xff]  ;;  %v596_v44 = vld [vmem:[#allocation2 + $0xc8] sm:$0xff]   ;;  %v462_v46 = vld [vmem:[%s709_s2 + $0x1] ss:$0 sm:$0xff] }
  0x1a   :  { %v597_v45 = vld [vmem:[#allocation2 + $0xc0] sm:$0xff]  }
  0x1b   :  { %525 = vmatpush3.bf16.msra.mxu1 %v584_v20  ;;  %v471_v54 = vld [vmem:[%s709_s2 + $0x2] ss:$0 sm:$0xff] }
  0x1c   :  { %487 = vmatpush3.bf16.msra.mxu0 %v573_v8  ;;  %526 = vmatprep.subr.bf16.mxu1 %v645_v0 }
  0x1d   :  { %488 = vmatprep.subr.bf16.mxu0 %v574_v9 }
  0x1f   :  { %527 = vmatpush3.bf16.msra.mxu1 %v585_v23 }
  0x20   :  { %489 = vmatpush3.bf16.msra.mxu0 %v575_v10  ;;  %528 = vmatprep.subr.bf16.mxu1 %v645_v0 }
  0x21   :  { %490 = vmatprep.subr.bf16.mxu0 %v576_v11 }
  0x23   :  { %529 = vmatpush3.bf16.msra.mxu1 %v586_v25 }
  0x24   :  { %491 = vmatpush3.bf16.msra.mxu0 %v577_v15  ;;  %530 = vmatprep.subr.bf16.mxu1 %v645_v0 }
  0x25   :  { %492 = vmatprep.subr.bf16.mxu0 %v578_v16 }
  0x27   :  { %531 = vmatpush3.bf16.msra.mxu1 %v587_v26 }
  0x28   :  { %493 = vmatpush3.bf16.msra.mxu0 %v579_v18  ;;  %532 = vmatprep.subr.bf16.mxu1 %v645_v0 }
  0x29   :  { %494 = vmatprep.subr.bf16.mxu0 %v580_v19 }
  0x2b   :  { %533 = vmatpush3.bf16.msra.mxu1 %v588_v27 }
  0x2c   :  { %495 = vmatpush3.bf16.msra.mxu0 %v581_v21  ;;  %534 = vmatprep.subr.bf16.mxu1 %v645_v0 }
  0x2d   :  { %540 = vmatprep.subr.bf16.mxu0 %v645_v0 }
  0x2f   :  { %200 = vmatmul.mubr.bf16.vlgmr.msra.gmra.mxu0 %v64_v24  ;;  %535 = vmatpush3.bf16.msra.mxu1 %v589_v28 }
  0x30   :  { %556 = vmatprep.mubr.msk.bf16.mxu0 %vm646_vm0, %v645_v0  ;;  %541 = vmatpush3.bf16.msra.mxu0 %v590_v29 }
  0x31   :  { %542 = vmatprep.subr.bf16.mxu0 %v645_v0 }
  0x34   :  { %543 = vmatpush3.bf16.msra.mxu0 %v591_v30 }
  0x35   :  { %544 = vmatprep.subr.bf16.mxu0 %v645_v0 }
  0x38   :  { %545 = vmatpush3.bf16.msra.mxu0 %v592_v31 }
  0x39   :  { %546 = vmatprep.subr.bf16.mxu0 %v645_v0 }
  0x3c   :  { %547 = vmatpush3.bf16.msra.mxu0 %v593_v32 }
  0x3d   :  { %548 = vmatprep.subr.bf16.mxu0 %v645_v0 }
  0x40   :  { %549 = vmatpush3.bf16.msra.mxu0 %v594_v33 }
  0x41   :  { %550 = vmatprep.subr.bf16.mxu0 %v645_v0 }
  0x44   :  { %551 = vmatpush3.bf16.msra.mxu0 %v595_v34 }
  0x45   :  { %552 = vmatprep.subr.bf16.mxu0 %v645_v0 }
  0x48   :  { %553 = vmatpush3.bf16.msra.mxu0 %v596_v44 }
  0x49   :  { %554 = vmatprep.subr.bf16.mxu0 %v645_v0 }
  0x4c   :  { %555 = vmatpush3.bf16.msra.mxu0 %v597_v45 }
  0xef   :  { %v496_v35 = vpop.f32.mrf.mxu0 }
  0xf1   :  { %v497_v37 = vpop.f32.mrf.mxu0 }
  0xf2   :  { %v498_v38 = vadd.f32 %v497_v37, %v496_v35 }
  0xf3   :  { %v499_v39 = vpop.f32.mrf.mxu0 }
  0xf4   :  { %v202_v40 = vadd.f32 %v498_v38, %v445_v36 }
  0xf5   :  { %v500_v41 = vpop.f32.mrf.mxu0 }
  0xf6   :  { %v207_v42 = vmax.f32 %v202_v40, 0.0 }
  0xf8   :  { %v224_v43 = vpack.c.bf16 %v207_v42, %v207_v42 }
  0xfa   :  { %537 = vmatmul.mubr.bf16.vlgmr.msra.gmra.mxu1 %v224_v43 }
 0x1ba   :  { %v312_v47 = vpop.f32.mrf.mxu1 }
 0x1bb   :  { %v313_v48 = vadd.f32 %v462_v46, %v312_v47 }
 0x1bc   :  { %v538_v49 = vpop.f32.mrf.mxu1 }
 0x1bd   :  { %v318_v50 = vmax.f32 %v313_v48, 0.0 }
 0x1be   :  { %v315_v51 = vpop.f32.mrf.mxu1 }
 0x1bf   :  { %v335_v52 = vpack.c.bf16 %v318_v50, %v318_v50 }
 0x1c0   :  { %v539_v53 = vpop.f32.mrf.mxu1 }
 0x1c1   :  { %557 = vmatmul.mubr.bf16.vlgmr.msra.gmra.mxu0 %v335_v52 }
 0x281   :  { %v423_v55 = vpop.f32.mrf.mxu0 }
 0x282   :  { %v424_v56 = vadd.f32 %v471_v54, %v423_v55 }
 0x283   :  { %v558_v57 = vpop.f32.mrf.mxu0 }
 0x284   :  { %429 = vst [vmem:[#allocation5] sm:$0xff] %v424_v56 }
 0x285   :  { %v426_v58 = vpop.f32.mrf.mxu0 }
 0x286   :  { %629 = shalt.err (!%p626_p9)
}
 0x287   :  { %439 = dma.vmem_to_hbm [thread:$0]  %s437_s28, 128, %s710_s3, [#allocation4]   ;;  %v559_v59 = vpop.f32.mrf.mxu0 }
 0x288   :  { %640 = dma.done.wait [#allocation4], 128  }
 0x289   :  { %641 = vsyncadd [#allocation4], 4294967168 }
 0x28a   :  { %443 = vsyncpa [#allocation3], 1 }
 0x28b   :  { %444 = vsyncpa [#allocation4], 1 }

</bundles_post_ra>
